<compile_context>
chip_gen: v5e
topology: v5e:2x2
jax: 0.10.0
libtpu: 0.0.40
codegen_flags: <defaults>
</compile_context>

<pallas_src>
import jax
import jax.numpy as jnp
from jax.experimental import pallas as pl
from jax.experimental.pallas import tpu as pltpu

DIM = 128      # model dim (lane-aligned)
HIDDEN = 512   # MLP hidden dim (2 hidden tiles at th=256 -> exercises the accumulator)
BATCH = 2
SEQ = 16       # N = B*S = 32 rows -> 2 row tiles of 16 (bf16 min tile (16,128))


# ---------------------------------------------------------------------------
# Pallas kernel: fused [gate|up] matmul + SiLU(gate*up) + accumulated down matmul
#   grid = (M_tiles, H_tiles); H is the reduction axis of the down projection.
# ---------------------------------------------------------------------------
def mlp_kernel(x_ref, wgu_ref, wd_ref, o_ref, acc_ref):
    h = pl.program_id(1)

    @pl.when(h == 0)
    def _init():
        acc_ref[...] = jnp.zeros_like(acc_ref)

    x = x_ref[...]                                                     # (tm, D) bf16
    # One MXU pass produces both gate and up for this hidden tile.
    gu = jnp.dot(x, wgu_ref[...], preferred_element_type=jnp.float32)  # (tm, 2*th) f32
    th = gu.shape[-1] // 2                                             # lane-aligned split
    g = gu[:, :th]
    u = gu[:, th:]

    prod = g * u                                                       # f32 on VPU
    act = prod * jax.nn.sigmoid(prod)                                  # SiLU(gate*up); sigmoid -> EUP

    acc_ref[...] += jnp.dot(act.astype(jnp.bfloat16), wd_ref[...],
                            preferred_element_type=jnp.float32)        # (tm, D) f32 acc

    @pl.when(h == pl.num_programs(1) - 1)
    def _store():
        o_ref[...] = acc_ref[...].astype(o_ref.dtype)                  # bf16, lane-dense (D=128)


# ---------------------------------------------------------------------------
# Weight pre-pack: interleave gate/up column tiles so one (D, 2*th) block per
# hidden step carries both.  Done once (here in the wrapper; at load time in
# production).
#   w_gu[:, h*2*th        : h*2*th +   th] == wg_t[:, h*th:(h+1)*th]
#   w_gu[:, h*2*th +  th  : h*2*th + 2*th] == wu_t[:, h*th:(h+1)*th]
# ---------------------------------------------------------------------------
def _pack_gate_up(wg_t, wu_t, th):
    D, H = wg_t.shape
    nt = H // th
    return jnp.concatenate(
        [wg_t.reshape(D, nt, 1, th), wu_t.reshape(D, nt, 1, th)], axis=2
    ).reshape(D, 2 * H)


# ---------------------------------------------------------------------------
# Wrapper: flatten (B, S, D) -> (B*S, D), tiled fused pallas_call
# ---------------------------------------------------------------------------
def llama_mlp(x, wg_t, wu_t, wd_t, *, tm=16, th=256):
    *lead, D = x.shape
    H = wg_t.shape[1]
    xf = x.reshape(-1, D)              # bf16 activations end-to-end (no f32 round trip)
    N = xf.shape[0]

    assert N % tm == 0 and tm % 16 == 0      # bf16 min tile is (16, 128)
    assert H % th == 0 and th % 128 == 0     # lane-aligned hidden tiles (free g/u slice)
    assert D % 128 == 0

    w_gu = _pack_gate_up(wg_t, wu_t, th)     # (D, 2H), interleaved per hidden tile

    out = pl.pallas_call(
        mlp_kernel,
        out_shape=jax.ShapeDtypeStruct((N, D), x.dtype),
        grid=(N // tm, H // th),             # rows parallel, hidden reduction last
        in_specs=[
            pl.BlockSpec((tm, D), lambda i, h: (i, 0)),       # activations: row tiles
            pl.BlockSpec((D, 2 * th), lambda i, h: (0, h)),   # fused [gate|up] weight tile
            pl.BlockSpec((th, D), lambda i, h: (h, 0)),       # down weight tile
        ],
        out_specs=pl.BlockSpec((tm, D), lambda i, h: (i, 0)), # constant over h -> accumulator
        scratch_shapes=[pltpu.VMEM((tm, D), jnp.float32)],    # f32 accumulator
        compiler_params=pltpu.CompilerParams(
            # rows are independent work (lets v7x shard across its 2 TCs);
            # hidden axis carries the accumulator -> "arbitrary".
            dimension_semantics=("parallel", "arbitrary")),
        # At production dims set vmem_limit_bytes per generation (see header);
        # at these toy dims the 32 MiB default is ample.
    )(xf, w_gu, wd_t)

    return out.reshape(*lead, D)


# ---------------------------------------------------------------------------
# Parameters (PyTorch nn.Linear stores (out, in); pre-transpose to (in, out))
# ---------------------------------------------------------------------------
def make_params(key):
    kg, ku, kd = jax.random.split(key, 3)
    wg = 0.02 * jax.random.normal(kg, (HIDDEN, DIM), dtype=jnp.float32)
    wu = 0.02 * jax.random.normal(ku, (HIDDEN, DIM), dtype=jnp.float32)
    wd = 0.02 * jax.random.normal(kd, (DIM, HIDDEN), dtype=jnp.float32)
    # Transposed for y = x @ W_t on the MXU; stored bf16 (f32 accumulation in-kernel).
    return (wg.T.astype(jnp.bfloat16),
            wu.T.astype(jnp.bfloat16),
            wd.T.astype(jnp.bfloat16))


# ---------------------------------------------------------------------------
# Pure-JAX reference mirroring the PyTorch forward (f32 math)
#   forward(x) = down_proj( SiLU( gate_proj(x) * up_proj(x) ) )
# ---------------------------------------------------------------------------
def reference_mlp(x, wg_t, wu_t, wd_t):
    xf = x.astype(jnp.float32)
    gated = xf @ wg_t.astype(jnp.float32)
    hidden = xf @ wu_t.astype(jnp.float32)
    return jax.nn.silu(gated * hidden) @ wd_t.astype(jnp.float32)


# ---------------------------------------------------------------------------
if __name__ == "__main__":
    key = jax.random.PRNGKey(0)
    pkey, xkey = jax.random.split(key)
    wg_t, wu_t, wd_t = make_params(pkey)
    x = jax.random.normal(xkey, (BATCH, SEQ, DIM), dtype=jnp.float32).astype(jnp.bfloat16)

    out = jax.jit(llama_mlp)(x, wg_t, wu_t, wd_t)
    out = jax.block_until_ready(out)

    ref = reference_mlp(x, wg_t, wu_t, wd_t)
    assert out.shape == (BATCH, SEQ, DIM), out.shape
    out_f32 = out.astype(jnp.float32)
    max_err = float(jnp.max(jnp.abs(out_f32 - ref)))
    # bf16 MXU operands / bf16 intermediates vs. f32 reference -> small, bounded mismatch.
    assert jnp.allclose(out_f32, ref, rtol=3e-2, atol=2e-3), max_err

    print("KERNEL_OK")
</pallas_src>

<mosaic_0001>
module attributes {stable_mosaic.version = 11 : i64} {
  func.func @mlp_kernel(%arg0: i32, %arg1: i32, %arg2: memref<16x128xbf16, #tpu.memory_space<vmem>>, %arg3: memref<128x512xbf16, #tpu.memory_space<vmem>>, %arg4: memref<256x128xbf16, #tpu.memory_space<vmem>>, %arg5: memref<16x128xbf16, #tpu.memory_space<vmem>>, %arg6: memref<16x128xf32, #tpu.memory_space<vmem>>) attributes {dimension_semantics = [#tpu.dimension_semantics<parallel>, #tpu.dimension_semantics<arbitrary>], iteration_bounds = array<i64: 2, 2>, scalar_prefetch = 0 : i64, scratch_operands = 1 : i64, tpu.core_type = #tpu.core_type<tc>, window_params = [{transform_indices = @transform_0, window_bounds = array<i64: 16, 128>}, {transform_indices = @transform_1, window_bounds = array<i64: 128, 512>}, {transform_indices = @transform_2, window_bounds = array<i64: 256, 128>}, {transform_indices = @transform_3, window_bounds = array<i64: 16, 128>}]} {
    %c0_i32 = arith.constant 0 : i32
    %0 = arith.cmpi eq, %arg1, %c0_i32 : i32
    %1 = arith.extui %0 : i1 to i32
    %c0_i32_0 = arith.constant 0 : i32
    %2 = arith.cmpi ne, %1, %c0_i32_0 : i32
    scf.if %2 {
      %cst_13 = arith.constant 0.000000e+00 : f32
      %24 = vector.broadcast %cst_13 : f32 to vector<16x128xf32>
      %c0_14 = arith.constant 0 : index
      %c0_15 = arith.constant 0 : index
      %25 = vector.load %arg6[%c0_14, %c0_15] : memref<16x128xf32, #tpu.memory_space<vmem>>, vector<16x128xf32>
      tpu.vector_store %arg6[%c0_14, %c0_15], %24 {strides = array<i32>} : memref<16x128xf32, #tpu.memory_space<vmem>>, vector<16x128xf32>,
    } else {
    }
    %c0 = arith.constant 0 : index
    %c0_1 = arith.constant 0 : index
    %3 = vector.load %arg2[%c0, %c0_1] : memref<16x128xbf16, #tpu.memory_space<vmem>>, vector<16x128xbf16>
    %c0_2 = arith.constant 0 : index
    %c0_3 = arith.constant 0 : index
    %4 = vector.load %arg3[%c0_2, %c0_3] : memref<128x512xbf16, #tpu.memory_space<vmem>>, vector<128x512xbf16>
    %cst = arith.constant dense<0.000000e+00> : vector<16x512xf32>
    %5 = tpu.matmul %3, %4, %cst {dimension_numbers = #tpu.dot_dimension_numbers<[1], [0], [0], [1], [0, 0, 1, 1], [], []>} : vector<16x128xbf16>, vector<128x512xbf16>, vector<16x512xf32> -> vector<16x512xf32>
    %6 = vector.extract_strided_slice %5 {offsets = [0, 0], sizes = [16, 256], strides = [1, 1]} : vector<16x512xf32> to vector<16x256xf32>
    %7 = vector.extract_strided_slice %5 {offsets = [0, 256], sizes = [16, 256], strides = [1, 1]} : vector<16x512xf32> to vector<16x256xf32>
    %8 = arith.mulf %6, %7 : vector<16x256xf32>
    %9 = arith.negf %8 : vector<16x256xf32>
    %10 = math.exp %9 : vector<16x256xf32>
    %cst_4 = arith.constant 1.000000e+00 : f32
    %11 = vector.broadcast %cst_4 : f32 to vector<16x256xf32>
    %12 = arith.addf %11, %10 : vector<16x256xf32>
    %13 = arith.divf %11, %12 : vector<16x256xf32>
    %14 = arith.mulf %8, %13 : vector<16x256xf32>
    %c0_5 = arith.constant 0 : index
    %c0_6 = arith.constant 0 : index
    %15 = vector.load %arg6[%c0_5, %c0_6] : memref<16x128xf32, #tpu.memory_space<vmem>>, vector<16x128xf32>
    %16 = arith.truncf %14 : vector<16x256xf32> to vector<16x256xbf16>
    %c0_7 = arith.constant 0 : index
    %c0_8 = arith.constant 0 : index
    %17 = vector.load %arg4[%c0_7, %c0_8] : memref<256x128xbf16, #tpu.memory_space<vmem>>, vector<256x128xbf16>
    %cst_9 = arith.constant dense<0.000000e+00> : vector<16x128xf32>
    %18 = tpu.matmul %16, %17, %cst_9 {dimension_numbers = #tpu.dot_dimension_numbers<[1], [0], [0], [1], [0, 0, 1, 1], [], []>} : vector<16x256xbf16>, vector<256x128xbf16>, vector<16x128xf32> -> vector<16x128xf32>
    %19 = arith.addf %15, %18 : vector<16x128xf32>
    %c0_10 = arith.constant 0 : index
    %c0_11 = arith.constant 0 : index
    %20 = vector.load %arg6[%c0_10, %c0_11] : memref<16x128xf32, #tpu.memory_space<vmem>>, vector<16x128xf32>
    tpu.vector_store %arg6[%c0_10, %c0_11], %19 {strides = array<i32>} : memref<16x128xf32, #tpu.memory_space<vmem>>, vector<16x128xf32>,
    %c1_i32 = arith.constant 1 : i32
    %21 = arith.cmpi eq, %arg1, %c1_i32 : i32
    %22 = arith.extui %21 : i1 to i32
    %c0_i32_12 = arith.constant 0 : i32
    %23 = arith.cmpi ne, %22, %c0_i32_12 : i32
    scf.if %23 {
      %c0_13 = arith.constant 0 : index
      %c0_14 = arith.constant 0 : index
      %24 = vector.load %arg6[%c0_13, %c0_14] : memref<16x128xf32, #tpu.memory_space<vmem>>, vector<16x128xf32>
      %25 = arith.truncf %24 : vector<16x128xf32> to vector<16x128xbf16>
      %c0_15 = arith.constant 0 : index
      %c0_16 = arith.constant 0 : index
      %26 = vector.load %arg5[%c0_15, %c0_16] : memref<16x128xbf16, #tpu.memory_space<vmem>>, vector<16x128xbf16>
      tpu.vector_store %arg5[%c0_15, %c0_16], %25 {strides = array<i32>} : memref<16x128xbf16, #tpu.memory_space<vmem>>, vector<16x128xbf16>,
    } else {
    }
    return
  }
  func.func @transform_0(%arg0: i32, %arg1: i32) -> (i32, i32) {
    %c0_i32 = arith.constant 0 : i32
    %c0_i32_0 = arith.constant 0 : i32
    return %arg0, %c0_i32 : i32, i32
  }
  func.func @transform_1(%arg0: i32, %arg1: i32) -> (i32, i32) {
    %c0_i32 = arith.constant 0 : i32
    %c0_i32_0 = arith.constant 0 : i32
    return %c0_i32, %arg1 : i32, i32
  }
  func.func @transform_2(%arg0: i32, %arg1: i32) -> (i32, i32) {
    %c0_i32 = arith.constant 0 : i32
    %c0_i32_0 = arith.constant 0 : i32
    return %arg1, %c0_i32 : i32, i32
  }
  func.func @transform_3(%arg0: i32, %arg1: i32) -> (i32, i32) {
    %c0_i32 = arith.constant 0 : i32
    %c0_i32_0 = arith.constant 0 : i32
    return %arg0, %c0_i32 : i32, i32
  }
}

</mosaic_0001>

<bundles_post_ra>
// kernel: llama_mlp.1
= control target key start
LH: loop header
LB: loop body
LE: loop exit
PB: predicated region body
PF: predicated region fallthrough
CT: control target
= control target key end

     0   :  { %s1821_s0 = inlined_call_operand.vmem [shape: bf16[32,128], index: 0, kind: input, shape index: {}]   ;;  %s1822_s1 = inlined_call_operand.vmem [shape: bf16[128,1024], index: 1, kind: input, shape index: {}]   ;;  %s1823_s2 = inlined_call_operand.vmem [shape: bf16[512,128], index: 2, kind: input, shape index: {}]   ;;  %s1824_s3 = inlined_call_operand.hbm [shape: bf16[32,128], index: 3, kind: output, shape index: {}]  }
   0x1   :  { %1827 = sst [smem:[#allocation8_spill]] %s1822_s1 }
   0x2   :  { %8 = vsyncpa [#allocation5], 0 }
   0x3   :  { %10 = vsyncpa [#allocation5 + $0x1], 0  ;;  %s1466_s12 = smov 0   ;;  %s1468_s13 = smov 0  }
   0x4   :  { %s1470_s14 = smov 0   ;;  %s1472_s15 = smov 0  }
   0x5   :  { %s1474_s16 = smov 0   ;;  %s1476_s17 = smov 0  }
   0x6   :  { %s1478_s18 = smov 0   ;;  %s1480_s19 = smov 0  }
   0x7   :  { %s1482_s20 = smov 0   ;;  %s1484_s21 = smov 0  }
   0x8 LB: > { %s948_s22 = sadd.s32 4294967295, %s1441_s21   ;;  %s949_s23 = sadd.s32 4294967294, %s1441_s21   ;;  %s1441_s21 = sphi %s1484_s21, %s16_s21   ;;  %s1437_s20 = sphi %s1482_s20, %s1847_s20   ;;  %s1433_s19 = sphi %s1480_s19, %s1846_s19   ;;  %s1429_s18 = sphi %s1478_s18, %s1845_s18   ;;  %s1425_s17 = sphi %s1476_s17, %s1844_s17   ;;  %s1421_s16 = sphi %s1474_s16, %s1843_s16   ;;  %s1417_s15 = sphi %s1472_s15, %s1842_s15   ;;  %s1413_s14 = sphi %s1470_s14, %s1841_s14   ;;  %s1409_s13 = sphi %s1468_s13, %s1840_s13   ;;  %s1405_s12 = sphi %s1466_s12, %s1839_s12  }
   0x9   : > { %s25_s24 = sadd.s32 1, %s1433_s19  ;;  %s28_s25 = sadd.s32 1, %s1437_s20 }
   0xa   : > { %p26_p0 = scmp.ge.s32.totalorder %s25_s24, 2  ;;  %s61_s26 = sadd.s32 1, %s1421_s16 }
   0xb   : > { %p68_p1 = scmp.ne.s32.totalorder %s1421_s16, %s1417_s15  ;;  %p69_p2 = scmp.eq.s32.totalorder %s1441_s21, 0 }
   0xc   : > { %s1849_s24 = smov (%p26_p0, %s25_s24), 0  ;;  %s1851_s25 = smov (!%p26_p0, %s28_s25), %s1437_s20 }
   0xd   : > { %s58_s27 = ssub.s32 %s1433_s19, %s1849_s24  ;;  %p1529_p3 = por %p69_p2, %p68_p1 }
   0xe   : > { %p30_p4 = scmp.ge.s32.totalorder %s1851_s25, 2  ;;  %p59_p5 = scmp.eq.s32.totalorder %s58_s27, 0 }
   0xf   : > { %s113_s29 = sadd.s32 1, %s1413_s14  ;;  %p123_p6 = scmp.ne.s32.totalorder %s1413_s14, %s1409_s13 }
  0x10   : > { %s1853_s25 = smov (%p30_p4, %s1851_s25), 0  ;;  %p124_p7 = scmp.eq.s32.totalorder %s948_s22, 3 }
  0x11   : > { %1829 = sst [smem:[#allocation7_spill]] %s1853_s25  ;;  %s110_s4 = ssub.s32 %s1437_s20, %s1853_s25 }
  0x12   : > { %s1539_s30 = scalar_select %p59_p5, %s1421_s16, %s61_s26  }
  0x13   : > { %p111_p8 = scmp.eq.s32.totalorder %s110_s4, 0  ;;  %p129_p9 = scmp.ne.s32.totalorder %s1409_s13, %s1405_s12 }
  0x14   : > { %p1545_p10 = por %p124_p7, %p123_p6  ;;  %p130_p11 = scmp.eq.s32.totalorder %s949_s23, 3 }
  0x15   : > { %s1550_s6 = scalar_select %p111_p8, %s1413_s14, %s113_s29  }
  0x16   : > { %p1552_p12 = por %p130_p11, %p129_p9  ;;  %p951_p13 = scmp.ge.s32.totalorder %s1441_s21, 4 }
  0x18   : > { %146 = sbr.rel (%p951_p13) target bundleno = 71 (0x47), region = 16 }
  0x1d   : > { %158 = sbr.rel (!%p1529_p3) target bundleno = 71 (0x47), region = 24  ;;  %s160_s8 = sand.u32 (%p1529_p3), 1, %s1421_s16  }
  0x1e   : > { %s1169_s9 = sshll.u32 (%p1529_p3), %s1433_s19, 4  ;;  %s952_s10 = sshll.u32 (%p1529_p3), %s160_s8, 8 }
  0x1f   : > { %s1832_s1 = sld [smem:[#allocation8_spill]] (%p1529_p3)  ;;  %s1569_s26 = scalar_lea.vmem (%p1529_p3), [#allocation3], %s952_s10 }
  0x25   : > { %s1564_s23 = scalar_lea.vmem %s1832_s1, %s1169_s9 }
  0x26   : > { %v178_v0 = vld [vmem:[%s1564_s23] sm:$0xff]  ;;  %v180_v1 = vld [vmem:[%s1564_s23 + $0x8] sm:$0xff] }
  0x27   : > { %v182_v2 = vld [vmem:[%s1564_s23 + $0x20] sm:$0xff]  ;;  %179 = vst [vmem:[%s1569_s26] sm:$0xff] %v178_v0  ;;  %v184_v3 = vld [vmem:[%s1564_s23 + $0x28] sm:$0xff] }
  0x28   : > { %181 = vst [vmem:[%s1569_s26 + $0x8] sm:$0xff] %v180_v1  ;;  %v186_v4 = vld [vmem:[%s1564_s23 + $0x40] sm:$0xff]  ;;  %v188_v5 = vld [vmem:[%s1564_s23 + $0x48] sm:$0xff] }
  0x29   : > { %183 = vst [vmem:[%s1569_s26 + $0x10] sm:$0xff] %v182_v2  ;;  %v190_v6 = vld [vmem:[%s1564_s23 + $0x60] sm:$0xff]  ;;  %v192_v7 = vld [vmem:[%s1564_s23 + $0x68] sm:$0xff] }
  0x2a   : > { %185 = vst [vmem:[%s1569_s26 + $0x18] sm:$0xff] %v184_v3  ;;  %v194_v8 = vld [vmem:[%s1564_s23 + $0x80] sm:$0xff]  ;;  %v196_v9 = vld [vmem:[%s1564_s23 + $0x88] sm:$0xff] }
  0x2b   : > { %187 = vst [vmem:[%s1569_s26 + $0x20] sm:$0xff] %v186_v4  ;;  %v198_v10 = vld [vmem:[%s1564_s23 + $0xa0] sm:$0xff]  ;;  %v200_v11 = vld [vmem:[%s1564_s23 + $0xa8] sm:$0xff] }
  0x2c   : > { %189 = vst [vmem:[%s1569_s26 + $0x28] sm:$0xff] %v188_v5  ;;  %v202_v12 = vld [vmem:[%s1564_s23 + $0xc0] sm:$0xff]  ;;  %v204_v13 = vld [vmem:[%s1564_s23 + $0xc8] sm:$0xff] }
  0x2d   : > { %191 = vst [vmem:[%s1569_s26 + $0x30] sm:$0xff] %v190_v6  ;;  %v206_v14 = vld [vmem:[%s1564_s23 + $0xe0] sm:$0xff]  ;;  %v208_v15 = vld [vmem:[%s1564_s23 + $0xe8] sm:$0xff] }
  0x2e   : > { %193 = vst [vmem:[%s1569_s26 + $0x38] sm:$0xff] %v192_v7  ;;  %v210_v16 = vld [vmem:[%s1564_s23 + $0x100] sm:$0xff]  ;;  %v212_v17 = vld [vmem:[%s1564_s23 + $0x108] sm:$0xff] }
  0x2f   : > { %195 = vst [vmem:[%s1569_s26 + $0x40] sm:$0xff] %v194_v8  ;;  %v214_v18 = vld [vmem:[%s1564_s23 + $0x120] sm:$0xff]  ;;  %v216_v19 = vld [vmem:[%s1564_s23 + $0x128] sm:$0xff] }
  0x30   : > { %197 = vst [vmem:[%s1569_s26 + $0x48] sm:$0xff] %v196_v9  ;;  %v218_v20 = vld [vmem:[%s1564_s23 + $0x140] sm:$0xff]  ;;  %v220_v21 = vld [vmem:[%s1564_s23 + $0x148] sm:$0xff] }
  0x31   : > { %199 = vst [vmem:[%s1569_s26 + $0x50] sm:$0xff] %v198_v10  ;;  %v222_v22 = vld [vmem:[%s1564_s23 + $0x160] sm:$0xff]  ;;  %v224_v23 = vld [vmem:[%s1564_s23 + $0x168] sm:$0xff] }
  0x32   : > { %201 = vst [vmem:[%s1569_s26 + $0x58] sm:$0xff] %v200_v11  ;;  %v226_v24 = vld [vmem:[%s1564_s23 + $0x180] sm:$0xff]  ;;  %v228_v25 = vld [vmem:[%s1564_s23 + $0x188] sm:$0xff] }
  0x33   : > { %203 = vst [vmem:[%s1569_s26 + $0x60] sm:$0xff] %v202_v12  ;;  %v230_v26 = vld [vmem:[%s1564_s23 + $0x1a0] sm:$0xff]  ;;  %v232_v27 = vld [vmem:[%s1564_s23 + $0x1a8] sm:$0xff] }
  0x34   : > { %205 = vst [vmem:[%s1569_s26 + $0x68] sm:$0xff] %v204_v13  ;;  %v234_v28 = vld [vmem:[%s1564_s23 + $0x1c0] sm:$0xff]  ;;  %v236_v29 = vld [vmem:[%s1564_s23 + $0x1c8] sm:$0xff] }
  0x35   : > { %207 = vst [vmem:[%s1569_s26 + $0x70] sm:$0xff] %v206_v14  ;;  %v238_v30 = vld [vmem:[%s1564_s23 + $0x1e0] sm:$0xff]  ;;  %v240_v31 = vld [vmem:[%s1564_s23 + $0x1e8] sm:$0xff] }
  0x36   : > { %209 = vst [vmem:[%s1569_s26 + $0x78] sm:$0xff] %v208_v15 }
  0x37   : > { %211 = vst [vmem:[%s1569_s26 + $0x80] sm:$0xff] %v210_v16 }
  0x38   : > { %213 = vst [vmem:[%s1569_s26 + $0x88] sm:$0xff] %v212_v17 }
  0x39   : > { %215 = vst [vmem:[%s1569_s26 + $0x90] sm:$0xff] %v214_v18 }
  0x3a   : > { %217 = vst [vmem:[%s1569_s26 + $0x98] sm:$0xff] %v216_v19 }
  0x3b   : > { %219 = vst [vmem:[%s1569_s26 + $0xa0] sm:$0xff] %v218_v20 }
  0x3c   : > { %221 = vst [vmem:[%s1569_s26 + $0xa8] sm:$0xff] %v220_v21 }
  0x3d   : > { %223 = vst [vmem:[%s1569_s26 + $0xb0] sm:$0xff] %v222_v22 }
  0x3e   : > { %225 = vst [vmem:[%s1569_s26 + $0xb8] sm:$0xff] %v224_v23 }
  0x3f   : > { %227 = vst [vmem:[%s1569_s26 + $0xc0] sm:$0xff] %v226_v24 }
  0x40   : > { %229 = vst [vmem:[%s1569_s26 + $0xc8] sm:$0xff] %v228_v25 }
  0x41   : > { %231 = vst [vmem:[%s1569_s26 + $0xd0] sm:$0xff] %v230_v26 }
  0x42   : > { %233 = vst [vmem:[%s1569_s26 + $0xd8] sm:$0xff] %v232_v27 }
  0x43   : > { %235 = vst [vmem:[%s1569_s26 + $0xe0] sm:$0xff] %v234_v28 }
  0x44   : > { %237 = vst [vmem:[%s1569_s26 + $0xe8] sm:$0xff] %v236_v29 }
  0x45   : > { %239 = vst [vmem:[%s1569_s26 + $0xf0] sm:$0xff] %v238_v30 }
  0x46   : > { %241 = vst [vmem:[%s1569_s26 + $0xf8] sm:$0xff] %v240_v31 }
  0x47 PF: > { %p955_p0 = scmp.ge.s32.totalorder %s1441_s21, 1  ;;  %p255_p1 = scmp.lt.s32.totalorder %s1441_s21, 5 }
  0x49   : > { %p256_p2 = pnand %p955_p0, %p255_p1 }
  0x4a   : > { %s262_s27 = sand.u32 (!%p256_p2), 1, %s1417_s15   ;;  %s1825_s28 = sand.u32 (!%p256_p2), 1, %s1409_s13  }
  0x4b   : > { %259 = sbr.rel (%p256_p2) target bundleno = 468 (0x1d4), region = 51  ;;  %s956_s29 = sshll.u32 (!%p256_p2), %s262_s27, 8 }
  0x4c   : > { %s1638_s4 = sshll.u32 (!%p256_p2), %s1825_s28, 3  ;;  %s958_s8 = sshll.u32 (!%p256_p2), %s1429_s18, 1 }
  0x4d   : > { %s960_s9 = sshll.u32 (!%p256_p2), %s1425_s17, 5  ;;  %p296_p3 = scmp.lt.s32.totalorder (!%p256_p2), %s958_s8, 3 }
  0x4e   : > { %p303_p4 = scmp.lt.s32.totalorder (!%p256_p2), %s960_s9, 63  ;;  %s1652_s28 = scalar_lea.vmem (!%p256_p2), [#allocation3], %s956_s29 }
  0x4f   : > { %s294_s25 = scalar_lea.vmem (!%p256_p2), [#allocation4], %s1638_s4  ;;  %p962_p5 = scmp.ne.s32.totalorder (!%p256_p2), %s1425_s17, 0 }
  0x50   : > { %s1855_s8 = smov (!%p296_p3, %s958_s8), 3  ;;  %s1857_s9 = smov (!%p303_p4, %s960_s9), 63 }
  0x51   : > { %s959_s10 = sshll.u32 %s1855_s8, 2  ;;  %s961_s26 = sshll.u32 %s1857_s9, 2 }
  0x52   : > { %s1645_s23 = scalar_lea.vmem %s1821_s0, %s959_s10  ;;  %s1650_s27 = scalar_lea.vmem %s1823_s2, %s961_s26 }
  0x53   : > { %312 = sbr.rel (%p962_p5) target bundleno = 91 (0x5b), region = 59 }
  0x58   : > { %v1443_v32 = vmov 0.0  }
  0x59   : > { %313 = vst [vmem:[#allocation2] sm:$0xff] %v1443_v32 }
  0x5a   : > { %314 = vst [vmem:[#allocation2 + $0x8] sm:$0xff] %v1443_v32 }
  0x5b PF: > { %v1081_v33 = vld [vmem:[%s1652_s28 + $0xe0] sm:$0xf]  ;;  %v1201_v34 = vld [vmem:[%s1652_s28 + $0xec] sm:$0xf0]  ;;  %v1199_v35 = vld [vmem:[%s1652_s28 + $0xe4] sm:$0xf] }
  0x5c   : > { %v1082_v36 = vor.u32 %v1201_v34, %v1081_v33  ;;  %v1083_v37 = vld [vmem:[%s1652_s28 + $0xf0] sm:$0xf0]  ;;  %v1089_v38 = vld [vmem:[%s1652_s28 + $0xe8] sm:$0xf]  ;;  %v1202_v39 = vld [vmem:[%s1652_s28 + $0xf4] sm:$0xf0] }
  0x5d   : > { %v1086_v40 = vor.u32 %v1199_v35, %v1083_v37  ;;  %v1090_v41 = vor.u32 %v1202_v39, %v1089_v38  ;;  %v1200_v42 = vld [vmem:[%s1652_s28 + $0xec] sm:$0xf]  ;;  %v1091_v43 = vld [vmem:[%s1652_s28 + $0xf8] sm:$0xf0]  ;;  %v1065_v44 = vld [vmem:[%s1652_s28 + $0xc0] sm:$0xf] }
  0x5e   : > { %515 = vmatpush.bf16.msra.mxu0 %v1082_v36  ;;  %v1094_v45 = vor.u32 %v1200_v42, %v1091_v43  ;;  %v1197_v46 = vld [vmem:[%s1652_s28 + $0xcc] sm:$0xf0]  ;;  %v1195_v47 = vld [vmem:[%s1652_s28 + $0xc4] sm:$0xf]  ;;  %v1067_v48 = vld [vmem:[%s1652_s28 + $0xd0] sm:$0xf0] }
  0x5f   : > { %529 = vmatpush.bf16.msra.mxu1 %v1086_v40  ;;  %543 = vmatpush.bf16.msra.mxu2 %v1090_v41  ;;  %v1066_v49 = vor.u32 %v1197_v46, %v1065_v44  ;;  %v1070_v50 = vor.u32 %v1195_v47, %v1067_v48  ;;  %v1073_v51 = vld [vmem:[%s1652_s28 + $0xc8] sm:$0xf]  ;;  %v1198_v52 = vld [vmem:[%s1652_s28 + $0xd4] sm:$0xf0]  ;;  %v1196_v53 = vld [vmem:[%s1652_s28 + $0xcc] sm:$0xf] }
  0x60   : > { %557 = vmatpush.bf16.msra.mxu3 %v1094_v45  ;;  %v1074_v54 = vor.u32 %v1198_v52, %v1073_v51  ;;  %v1075_v55 = vld [vmem:[%s1652_s28 + $0xd8] sm:$0xf0]  ;;  %v1049_v56 = vld [vmem:[%s1652_s28 + $0xa0] sm:$0xf]  ;;  %v1193_v57 = vld [vmem:[%s1652_s28 + $0xac] sm:$0xf0] }
  0x61   : > { %v1078_v58 = vor.u32 %v1196_v53, %v1075_v55  ;;  %v1191_v59 = vld [vmem:[%s1652_s28 + $0xa4] sm:$0xf]  ;;  %v1051_v60 = vld [vmem:[%s1652_s28 + $0xb0] sm:$0xf0]  ;;  %v1057_v61 = vld [vmem:[%s1652_s28 + $0xa8] sm:$0xf]  ;;  %v1050_v62 = vor.u32 %v1193_v57, %v1049_v56 }
  0x62   : > { %516 = vmatpush.bf16.msra.mxu0 %v1066_v49  ;;  %v1194_v63 = vld [vmem:[%s1652_s28 + $0xb4] sm:$0xf0]  ;;  %v1192_v0 = vld [vmem:[%s1652_s28 + $0xac] sm:$0xf]  ;;  %v1059_v1 = vld [vmem:[%s1652_s28 + $0xb8] sm:$0xf0]  ;;  %v1054_v2 = vor.u32 %v1191_v59, %v1051_v60 }
  0x63   : > { %530 = vmatpush.bf16.msra.mxu1 %v1070_v50  ;;  %544 = vmatpush.bf16.msra.mxu2 %v1074_v54  ;;  %v1058_v3 = vor.u32 %v1194_v63, %v1057_v61  ;;  %v1033_v4 = vld [vmem:[%s1652_s28 + $0x80] sm:$0xf]  ;;  %v1189_v5 = vld [vmem:[%s1652_s28 + $0x8c] sm:$0xf0]  ;;  %v1187_v6 = vld [vmem:[%s1652_s28 + $0x84] sm:$0xf]  ;;  %v1062_v7 = vor.u32 %v1192_v0, %v1059_v1 }
  0x64   : > { %558 = vmatpush.bf16.msra.mxu3 %v1078_v58  ;;  %v1035_v8 = vld [vmem:[%s1652_s28 + $0x90] sm:$0xf0]  ;;  %v1041_v9 = vld [vmem:[%s1652_s28 + $0x88] sm:$0xf]  ;;  %v1190_v10 = vld [vmem:[%s1652_s28 + $0x94] sm:$0xf0]  ;;  %v1034_v13 = vor.u32 %v1189_v5, %v1033_v4 }
  0x65   : > { %v1188_v11 = vld [vmem:[%s1652_s28 + $0x8c] sm:$0xf]  ;;  %v1043_v12 = vld [vmem:[%s1652_s28 + $0x98] sm:$0xf0]  ;;  %v1038_v14 = vor.u32 %v1187_v6, %v1035_v8  ;;  %v1042_v15 = vor.u32 %v1190_v10, %v1041_v9  ;;  %v1017_v16 = vld [vmem:[%s1652_s28 + $0x60] sm:$0xf] }
  0x66   : > { %517 = vmatpush.bf16.msra.mxu0 %v1050_v62  ;;  %v1185_v17 = vld [vmem:[%s1652_s28 + $0x6c] sm:$0xf0]  ;;  %v1183_v18 = vld [vmem:[%s1652_s28 + $0x64] sm:$0xf]  ;;  %v1046_v19 = vor.u32 %v1188_v11, %v1043_v12  ;;  %v1019_v20 = vld [vmem:[%s1652_s28 + $0x70] sm:$0xf0] }
  0x67   : > { %531 = vmatpush.bf16.msra.mxu1 %v1054_v2  ;;  %545 = vmatpush.bf16.msra.mxu2 %v1058_v3  ;;  %v1025_v21 = vld [vmem:[%s1652_s28 + $0x68] sm:$0xf]  ;;  %v1186_v22 = vld [vmem:[%s1652_s28 + $0x74] sm:$0xf0]  ;;  %v1184_v23 = vld [vmem:[%s1652_s28 + $0x6c] sm:$0xf]  ;;  %v1018_v25 = vor.u32 %v1185_v17, %v1017_v16  ;;  %v1022_v26 = vor.u32 %v1183_v18, %v1019_v20 }
  0x68   : > { %559 = vmatpush.bf16.msra.mxu3 %v1062_v7  ;;  %v1027_v24 = vld [vmem:[%s1652_s28 + $0x78] sm:$0xf0]  ;;  %v1026_v27 = vor.u32 %v1186_v22, %v1025_v21  ;;  %v1001_v28 = vld [vmem:[%s1652_s28 + $0x40] sm:$0xf]  ;;  %v1181_v29 = vld [vmem:[%s1652_s28 + $0x4c] sm:$0xf0] }
  0x69   : > { %v1179_v30 = vld [vmem:[%s1652_s28 + $0x44] sm:$0xf]  ;;  %v1030_v31 = vor.u32 %v1184_v23, %v1027_v24  ;;  %v1003_v32 = vld [vmem:[%s1652_s28 + $0x50] sm:$0xf0]  ;;  %v1009_v33 = vld [vmem:[%s1652_s28 + $0x48] sm:$0xf]  ;;  %v1002_v37 = vor.u32 %v1181_v29, %v1001_v28 }
  0x6a   : > { %518 = vmatpush.bf16.msra.mxu0 %v1034_v13  ;;  %v1182_v34 = vld [vmem:[%s1652_s28 + $0x54] sm:$0xf0]  ;;  %v1180_v35 = vld [vmem:[%s1652_s28 + $0x4c] sm:$0xf]  ;;  %v1011_v36 = vld [vmem:[%s1652_s28 + $0x58] sm:$0xf0]  ;;  %v1006_v38 = vor.u32 %v1179_v30, %v1003_v32 }
  0x6b   : > { %532 = vmatpush.bf16.msra.mxu1 %v1038_v14  ;;  %546 = vmatpush.bf16.msra.mxu2 %v1042_v15  ;;  %v1010_v39 = vor.u32 %v1182_v34, %v1009_v33  ;;  %v985_v40 = vld [vmem:[%s1652_s28 + $0x20] sm:$0xf]  ;;  %v1177_v41 = vld [vmem:[%s1652_s28 + $0x2c] sm:$0xf0]  ;;  %v1175_v42 = vld [vmem:[%s1652_s28 + $0x24] sm:$0xf]  ;;  %v1014_v43 = vor.u32 %v1180_v35, %v1011_v36 }
  0x6c   : > { %560 = vmatpush.bf16.msra.mxu3 %v1046_v19  ;;  %v987_v44 = vld [vmem:[%s1652_s28 + $0x30] sm:$0xf0]  ;;  %v993_v45 = vld [vmem:[%s1652_s28 + $0x28] sm:$0xf]  ;;  %v1178_v46 = vld [vmem:[%s1652_s28 + $0x34] sm:$0xf0]  ;;  %v986_v49 = vor.u32 %v1177_v41, %v985_v40 }
  0x6d   : > { %v1176_v47 = vld [vmem:[%s1652_s28 + $0x2c] sm:$0xf]  ;;  %v995_v48 = vld [vmem:[%s1652_s28 + $0x38] sm:$0xf0]  ;;  %v990_v50 = vor.u32 %v1175_v42, %v987_v44  ;;  %v994_v51 = vor.u32 %v1178_v46, %v993_v45  ;;  %v969_v52 = vld [vmem:[%s1652_s28] sm:$0xf] }
  0x6e   : > { %519 = vmatpush.bf16.msra.mxu0 %v1018_v25  ;;  %v1173_v53 = vld [vmem:[%s1652_s28 + $0xc] sm:$0xf0]  ;;  %v1171_v54 = vld [vmem:[%s1652_s28 + $0x4] sm:$0xf]  ;;  %v998_v55 = vor.u32 %v1176_v47, %v995_v48  ;;  %v971_v56 = vld [vmem:[%s1652_s28 + $0x10] sm:$0xf0] }
  0x6f   : > { %533 = vmatpush.bf16.msra.mxu1 %v1022_v26  ;;  %547 = vmatpush.bf16.msra.mxu2 %v1026_v27  ;;  %v977_v57 = vld [vmem:[%s1652_s28 + $0x8] sm:$0xf]  ;;  %v1174_v58 = vld [vmem:[%s1652_s28 + $0x14] sm:$0xf0]  ;;  %v1172_v59 = vld [vmem:[%s1652_s28 + $0xc] sm:$0xf]  ;;  %v970_v61 = vor.u32 %v1173_v53, %v969_v52  ;;  %v974_v62 = vor.u32 %v1171_v54, %v971_v56 }
  0x70   : > { %561 = vmatpush.bf16.msra.mxu3 %v1030_v31  ;;  %v979_v60 = vld [vmem:[%s1652_s28 + $0x18] sm:$0xf0]  ;;  %v978_v63 = vor.u32 %v1174_v58, %v977_v57  ;;  %v1170_v1 = vld [vmem:[%s1645_s23] sm:$0xff]  ;;  %v1210_v2 = vld [vmem:[%s1650_s27 + $0x38] sm:$0xff]  ;;  %p1163_p6 = scmp.ne.s32.totalorder %s1425_s17, 1 }
  0x71   : > { %v982_v0 = vor.u32 %v1172_v59, %v979_v60  ;;  %v1218_v3 = vld [vmem:[%s1650_s27 + $0x78] sm:$0xff]  ;;  %v1209_v4 = vld [vmem:[%s1650_s27 + $0x30] sm:$0xff]  ;;  %v1208_v6 = vld [vmem:[%s1650_s27 + $0x28] sm:$0xff] }
  0x72   : > { %520 = vmatpush.bf16.msra.mxu0 %v1002_v37  ;;  %v1217_v5 = vld [vmem:[%s1650_s27 + $0x70] sm:$0xff]  ;;  %v1216_v7 = vld [vmem:[%s1650_s27 + $0x68] sm:$0xff]  ;;  %v1207_v8 = vld [vmem:[%s1650_s27 + $0x20] sm:$0xff] }
  0x73   : > { %534 = vmatpush.bf16.msra.mxu1 %v1006_v38  ;;  %548 = vmatpush.bf16.msra.mxu2 %v1010_v39  ;;  %v1215_v9 = vld [vmem:[%s1650_s27 + $0x60] sm:$0xff]  ;;  %v1206_v11 = vld [vmem:[%s1650_s27 + $0x18] sm:$0xff]  ;;  %v1205_v18 = vld [vmem:[%s1650_s27 + $0x10] sm:$0xff] }
  0x74   : > { %562 = vmatpush.bf16.msra.mxu3 %v1014_v43  ;;  %v1214_v12 = vld [vmem:[%s1650_s27 + $0x58] sm:$0xff]  ;;  %v1213_v19 = vld [vmem:[%s1650_s27 + $0x50] sm:$0xff]  ;;  %v1204_v22 = vld [vmem:[%s1650_s27 + $0x8] sm:$0xff] }
  0x75   : > { %v1212_v23 = vld [vmem:[%s1650_s27 + $0x48] sm:$0xff]  ;;  %v1203_v30 = vld [vmem:[%s1650_s27] sm:$0xff] }
  0x76   : > { %521 = vmatpush.bf16.msra.mxu0 %v986_v49  ;;  %v1211_v31 = vld [vmem:[%s1650_s27 + $0x40] sm:$0xff] }
  0x77   : > { %535 = vmatpush.bf16.msra.mxu1 %v990_v50  ;;  %549 = vmatpush.bf16.msra.mxu2 %v994_v51 }
  0x78   : > { %563 = vmatpush.bf16.msra.mxu3 %v998_v55 }
  0x7a   : > { %522 = vmatpush.bf16.msra.mxu0 %v970_v61 }
  0x7b   : > { %536 = vmatpush.bf16.msra.mxu1 %v974_v62  ;;  %550 = vmatpush.bf16.msra.mxu2 %v978_v63 }
  0x7c   : > { %564 = vmatpush.bf16.msra.mxu3 %v982_v0 }
  0x7d   : > { %523 = vmatmul.bf16.vlgmr.msra.gmra.mxu0 %v1170_v1 }
  0x7e   : > { %537 = vmatmul.bf16.vlgmr.msra.gmra.mxu1 %v1170_v1  ;;  %551 = vmatmul.bf16.vlgmr.msra.gmra.mxu2 %v1170_v1 }
  0x7f   : > { %565 = vmatmul.bf16.vlgmr.msra.gmra.mxu3 %v1170_v1  ;;  %787 = vmatpush.bf16.msrb.mxu0 %v1210_v2 }
  0x80   : > { %801 = vmatpush.bf16.msrb.mxu1 %v1218_v3 }
  0x83   : > { %788 = vmatpush.bf16.msrb.mxu0 %v1209_v4 }
  0x84   : > { %802 = vmatpush.bf16.msrb.mxu1 %v1217_v5 }
  0x87   : > { %789 = vmatpush.bf16.msrb.mxu0 %v1208_v6 }
  0x88   : > { %803 = vmatpush.bf16.msrb.mxu1 %v1216_v7 }
  0x8b   : > { %790 = vmatpush.bf16.msrb.mxu0 %v1207_v8 }
  0x8c   : > { %804 = vmatpush.bf16.msrb.mxu1 %v1215_v9 }
  0x8f   : > { %791 = vmatpush.bf16.msrb.mxu0 %v1206_v11 }
  0x90   : > { %805 = vmatpush.bf16.msrb.mxu1 %v1214_v12 }
  0x93   : > { %792 = vmatpush.bf16.msrb.mxu0 %v1205_v18 }
  0x94   : > { %806 = vmatpush.bf16.msrb.mxu1 %v1213_v19 }
  0x97   : > { %793 = vmatpush.bf16.msrb.mxu0 %v1204_v22 }
  0x98   : > { %807 = vmatpush.bf16.msrb.mxu1 %v1212_v23 }
  0x9b   : > { %794 = vmatpush.bf16.msrb.mxu0 %v1203_v30 }
  0x9c   : > { %808 = vmatpush.bf16.msrb.mxu1 %v1211_v31  ;;  %v655_v31 = vld [vmem:[#allocation2] sm:$0xff] }
  0xfa   : > { %v524_v10 = vpop.f32.mrf.mxu0 }
  0xfb   : > { %v538_v13 = vpop.f32.mrf.mxu1 }
 0x101   : > { %v552_v14 = vpop.f32.mrf.mxu2 }
 0x102   : > { %v1731_v15 = vmul.f32 %v552_v14, %v524_v10  ;;  %v566_v16 = vpop.f32.mrf.mxu3  ;;  %v526_v24 = vpop.f32.mrf.mxu0 }
 0x103   : > { %v1733_v17 = vmul.f32 %v566_v16, %v538_v13  ;;  %v540_v26 = vpop.f32.mrf.mxu1 }
 0x104   : > { %v1095_v20 = vmul.f32 -1.442695, %v1731_v15 }
 0x105   : > { %v1096_v21 = vmul.f32 -1.442695, %v1733_v17 }
 0x106   : > { %1315 = vpow2.f32 %v1095_v20 }
 0x107   : > { %1317 = vpow2.f32 %v1096_v21 }
 0x109   : > { %v554_v25 = vpop.f32.mrf.mxu2 }
 0x10a   : > { %v1741_v27 = vmul.f32 %v554_v25, %v526_v24  ;;  %v568_v28 = vpop.f32.mrf.mxu3 }
 0x10b   : > { %v1743_v29 = vmul.f32 %v568_v28, %v540_v26 }
 0x10c   : > { %v1316_v32 = vpop.eup %1315  ;;  %v1097_v33 = vmul.f32 -1.442695, %v1741_v27 }
 0x10d   : > { %v1318_v34 = vpop.eup %1317  ;;  %v587_v35 = vadd.f32 1.0, %v1316_v32  ;;  %v1098_v36 = vmul.f32 -1.442695, %v1743_v29 }
 0x10e   : > { %v588_v37 = vadd.f32 1.0, %v1318_v34  ;;  %1319 = vpow2.f32 %v1097_v33  ;;  %v656_v34 = vld [vmem:[#allocation2 + $0x8] sm:$0xff] }
 0x10f   : > { %1321 = vrcp.f32 %v587_v35  ;;  %vm596_vm1 = vweird.f32 %v587_v35  ;;  %v600_v53 = vand.u32 2147483647, %v587_v35  ;;  %v602_v54 = vand.u32 2147483648, %v587_v35 }
 0x110   : > { %1323 = vrcp.f32 %v588_v37  ;;  %vm611_vm2 = vweird.f32 %v588_v37  ;;  %v615_v56 = vand.u32 2147483647, %v588_v37  ;;  %v617_v61 = vand.u32 2147483648, %v588_v37 }
 0x111   : > { %1325 = vpow2.f32 %v1098_v36  ;;  %vm601_vm6 = vcmp.eq.f32.partialorder %v600_v53, 8.507059e+37  ;;  %v603_v2 = vor.u32 1.1754944e-38, %v602_v54 }
 0x112   : > { %v618_v12 = vor.u32 1.1754944e-38, %v617_v61  ;;  %vm616_vm12 = vcmp.eq.f32.partialorder %v615_v56, 8.507059e+37 }
 0x114   : > { %v1320_v38 = vpop.eup %1319 }
 0x115   : > { %v1322_v39 = vpop.eup %1321  ;;  %v589_v40 = vadd.f32 1.0, %v1320_v38 }
 0x116   : > { %v1324_v41 = vpop.eup %1323  ;;  %v592_v42 = vmul.f32 %v1322_v39, %v587_v35  ;;  %vm597_vm0 = vweird.f32 %v1322_v39 }
 0x117   : > { %v1326_v43 = vpop.eup %1325  ;;  %v607_v44 = vmul.f32 %v1324_v41, %v588_v37  ;;  %1327 = vrcp.f32 %v589_v40  ;;  %v632_v58 = vand.u32 2147483648, %v589_v40  ;;  %vm1749_vm3 = vmor %vm596_vm1, %vm597_vm0  ;;  %vm612_vm4 = vweird.f32 %v1324_v41 }
 0x118   : > { %v593_v45 = vsub.f32 1.0, %v592_v42  ;;  %v590_v46 = vadd.f32 1.0, %v1326_v43  ;;  %v630_v1 = vand.u32 2147483647, %v589_v40  ;;  %vm626_vm7 = vweird.f32 %v589_v40  ;;  %vm1756_vm8 = vmor %vm611_vm2, %vm612_vm4 }
 0x119   : > { %v608_v47 = vsub.f32 1.0, %v607_v44  ;;  %v633_v6 = vor.u32 1.1754944e-38, %v632_v58 }
 0x11a   : > { %v594_v48 = vmul.f32 %v1322_v39, %v593_v45  ;;  %1329 = vrcp.f32 %v590_v46  ;;  %v645_v7 = vand.u32 2147483647, %v590_v46  ;;  %v647_v8 = vand.u32 2147483648, %v590_v46 }
 0x11b   : > { %v609_v50 = vmul.f32 %v1324_v41, %v608_v47  ;;  %vm631_vm11 = vcmp.eq.f32.partialorder %v630_v1, 8.507059e+37  ;;  %vm641_vm13 = vweird.f32 %v590_v46 }
 0x11c   : > { %v595_v51 = vadd.f32 %v1322_v39, %v594_v48  ;;  %v648_v21 = vor.u32 1.1754944e-38, %v647_v8  ;;  %vm646_vm15 = vcmp.eq.f32.partialorder %v645_v7, 8.507059e+37 }
 0x11d   : > { %v1328_v49 = vpop.eup %1327  ;;  %v610_v60 = vadd.f32 %v1324_v41, %v609_v50 }
 0x11e   : > { %v622_v52 = vmul.f32 %v1328_v49, %v589_v40  ;;  %v599_v63 = vsel %vm1749_vm3, %v1322_v39, %v595_v51  ;;  %vm627_vm5 = vweird.f32 %v1328_v49 }
 0x11f   : > { %v604_v9 = vsel %vm601_vm6, %v603_v2, %v599_v63  ;;  %v614_v10 = vsel %vm1756_vm8, %v1324_v41, %v610_v60  ;;  %vm628_vm9 = vmor %vm626_vm7, %vm627_vm5 }
 0x120   : > { %v1330_v55 = vpop.eup %1329  ;;  %v623_v57 = vsub.f32 1.0, %v622_v52  ;;  %v651_v18 = vmul.f32 %v604_v9, %v1731_v15  ;;  %v619_v19 = vsel %vm616_vm12, %v618_v12, %v614_v10 }
 0x121   : > { %v637_v62 = vmul.f32 %v1330_v55, %v590_v46  ;;  %vm642_vm10 = vweird.f32 %v1330_v55  ;;  %v652_v25 = vmul.f32 %v619_v19, %v1733_v17 }
 0x122   : > { %v624_v0 = vmul.f32 %v1328_v49, %v623_v57  ;;  %vm643_vm14 = vmor %vm641_vm13, %vm642_vm10 }
 0x123   : > { %v638_v3 = vsub.f32 1.0, %v637_v62 }
 0x124   : > { %v625_v5 = vadd.f32 %v1328_v49, %v624_v0 }
 0x125   : > { %v639_v11 = vmul.f32 %v1330_v55, %v638_v3 }
 0x126   : > { %v629_v13 = vsel %vm628_vm9, %v1328_v49, %v625_v5 }
 0x127   : > { %v634_v14 = vsel %vm631_vm11, %v633_v6, %v629_v13  ;;  %v640_v16 = vadd.f32 %v1330_v55, %v639_v11 }
 0x128   : > { %v653_v20 = vmul.f32 %v634_v14, %v1741_v27 }
 0x129   : > { %v644_v22 = vsel %vm643_vm14, %v1330_v55, %v640_v16 }
 0x12a   : > { %v649_v23 = vsel %vm646_vm15, %v648_v21, %v644_v22  ;;  %v657_v24 = vpack.c.bf16 %v653_v20, %v651_v18 }
 0x12b   : > { %v654_v26 = vmul.f32 %v649_v23, %v1743_v29 }
 0x12c   : > { %795 = vmatmul.bf16.vlgmr.msrb.gmra.mxu0 %v657_v24 }
 0x12d   : > { %v658_v28 = vpack.c.bf16 %v654_v26, %v652_v25 }
 0x12f   : > { %809 = vmatmul.bf16.vlgmr.msrb.gmra.mxu1 %v658_v28 }
 0x1a9   : > { %v796_v30 = vpop.f32.mrf.mxu0 }
 0x1ac   : > { %v810_v32 = vpop.f32.mrf.mxu1 }
 0x1ad   : > { %v811_v15 = vadd.f32 %v810_v32, %v796_v30 }
 0x1af   : > { %v815_v33 = vadd.f32 %v811_v15, %v655_v31 }
 0x1b1   : > { %817 = vst [vmem:[#allocation2] sm:$0xff] %v815_v33  ;;  %v798_v27 = vpop.f32.mrf.mxu0 }
 0x1b4   : > { %v812_v35 = vpop.f32.mrf.mxu1 }
 0x1b5   : > { %v813_v36 = vadd.f32 %v812_v35, %v798_v27  ;;  %822 = sbr.rel (%p1163_p6) target bundleno = 452 (0x1c4), region = 63 }
 0x1b7   : > { %v816_v37 = vadd.f32 %v813_v36, %v656_v34 }
 0x1b9   : > { %818 = vst [vmem:[#allocation2 + $0x8] sm:$0xff] %v816_v37 }
 0x1ba   : > { %v823_v17 = vld [vmem:[#allocation2] sm:$0xff] }
 0x1c0   : > { %v824_v29 = vld [vmem:[#allocation2 + $0x8] sm:$0xff] }
 0x1c1   : > { %v1223_v38 = vpack.c.bf16 %v824_v29, %v823_v17 }
 0x1c3   : > { %1224 = vst [vmem:[%s294_s25] sm:$0xff] %v1223_v38  }
 0x1c4 PF: > { %s1219_s1 = sshll.u32 %s1429_s18, 3  ;;  %s842_s9 = sshll.u32 %s294_s25, 4  ;;  %s843_s9 = int_to_ptr.vmem [resolvable:$true] %s842_s9 }
 0x1c5   : > { %s841_s8 = scalar_lea.hbm %s1824_s3, %s1219_s1  ;;  %s1837_s10 = sand.u32 1, %s1409_s13  }
 0x1c6   : > { %s844_s17 = sshll.u32 %s841_s8, 4  ;;  %s830_s11 = scalar_lea.sflag [#allocation5], %s1837_s10  ;;  %s845_s17 = int_to_ptr.hbm [resolvable:$true] %s844_s17 }
 0x1c7   : > { %s1345_s22 = sshra.s32 %s845_s17, 4  ;;  %s1351_s15 = scalar_lea.hbm %s1824_s3, 16  ;;  %s1346_s22 = int_to_ptr.hbm [resolvable:$true] %s1345_s22 }
 0x1c8   : > { %s1347_s23 = scalar_lea.hbm %s1346_s22, 8  ;;  %p1352_p11 = scmp.lt.s32.totalorder %s1346_s22, %s1824_s3 }
 0x1c9   : > { %p1348_p7 = scmp.ne.s32.totalorder %s1346_s22, %s1347_s23  ;;  %p1353_p13 = scmp.lt.s32.totalorder %s1351_s15, %s1347_s23 }
 0x1cb   : > { %p1349_p8 = pnand %p1348_p7, %p1545_p10  ;;  %p1354_p0 = por %p1353_p13, %p1352_p11 }
 0x1cd   : > { %p1350_p9 = pneg %p1349_p8 }
 0x1cf   : > { %p1355_p1 = pnand %p1354_p0, %p1350_p9 }
 0x1d1   : > { %1358 = shalt.err (!%p1355_p1)
}
 0x1d2   : > { %s1444_s25 = smov 64   ;;  %s1445_s4 = smov 4  }
 0x1d3   : > { %1225 = dma.vmem_to_hbm [thread:$0]  (%p1545_p10), %s843_s9, 128, %s845_s17, %s830_s11, %s1444_s25, %s1444_s25, %s1445_s4  }
 0x1d4 PF: > { %p1231_p2 = scmp.ge.s32.totalorder %s1441_s21, 2  ;;  %s859_s28 = sand.u32 1, %s1405_s12  }
 0x1d5   : > { %s860_s29 = scalar_lea.sflag [#allocation5], %s859_s28 }
 0x1d6   : > { %p1228_p3 = pnand %p1231_p2, %p1552_p12 }
 0x1d8   : > { %p1229_p4 = pneg %p1228_p3 }
 0x1da   : > { %1400 = dma.done.wait (%p1229_p4), %s860_s29, 128  }
 0x1db   : > { %1402 = vsyncadd (%p1229_p4), %s860_s29, 4294967168  ;;  %s16_s21 = sadd.s32 1, %s1441_s21   ;;  %s1838_s5 = sld [smem:[#allocation7_spill]] }
 0x1dc   : > { %p13_p5 = scmp.ge.s32.totalorder %s16_s21, 6   ;;  %s1839_s12 = smov %s1409_s13 }
 0x1dd   : > { %s1840_s13 = smov %s1413_s14  ;;  %s1841_s14 = smov %s1550_s6 }
 0x1de   : > { %s1842_s15 = smov %s1421_s16  ;;  %s1843_s16 = smov %s1539_s30 }
 0x1df   : > { %s1844_s17 = smov %s1433_s19  ;;  %s1845_s18 = smov %s1437_s20 }
 0x1e0   : > { %s1846_s19 = smov %s1849_s24  ;;  %15 = sbr.rel (!%p13_p5) target bundleno = 8 (0x8), region = 109 }
 0x1e1   : > { %s1847_s20 = smov %s1838_s5 }
 0x1e5   :  { %866 = vsyncpa [#allocation5], 1 }
 0x1e6   :  { %868 = vsyncpa [#allocation5 + $0x1], 1 }

</bundles_post_ra>
